<compile_context>
chip_gen: v7x
topology: tpu7x:2x2x1
jax: 0.10.0
libtpu: 0.0.40
codegen_flags: <defaults>
</compile_context>

<pallas_src>
import functools

import jax
import jax.numpy as jnp
from jax import lax
from jax.experimental import pallas as pl
from jax.experimental.pallas import tpu as pltpu


def _round_up(x, m):
    return (x + m - 1) // m * m


# dot_general contracting the last (K) axis of both operands: x[tm,K] @ w[tn,K]^T
_TRANS_B_DIMS = (((1,), (1,)), ((), ()))


def _qlinear_kernel(scalars_ref, x_ref, w_ref, ascale_ref, rscale_ref,
                    obias_ref, out_ref, *, with_requant):
    # scalars_ref (SMEM f32[2]) = [inv_output_scale, output_zero_point]
    # x_ref : [tm, K] int8   (quantized activations, raw)
    # w_ref : [tn, K] int8   (quantized weights, raw, PyTorch [N,K] layout)
    # ascale/rscale/obias : [1, tn] f32  (folded per-channel epilogue params)

    # Exact int8 -> bf16 (all int8 values are representable in bf16).
    x_f = x_ref[...].astype(jnp.float32)                    # [tm, K]
    x_bf = x_f.astype(jnp.bfloat16)
    w_bf = w_ref[...].astype(jnp.float32).astype(jnp.bfloat16)  # [tn, K]

    # Raw quantized matmul on the MXU, f32 accumulation (exact for int8 data).
    acc = lax.dot_general(x_bf, w_bf, dimension_numbers=_TRANS_B_DIMS,
                          preferred_element_type=jnp.float32)   # [tm, tn]

    # Per-row sum of quantized activations (for the weight-zero-point term).
    rowsum = jnp.sum(x_f, axis=1, keepdims=True)            # [tm, 1]

    # Fused dequant + bias epilogue on the [tm, tn] accumulator.
    y = acc * ascale_ref[...] - rowsum * rscale_ref[...] + obias_ref[...]

    if with_requant:
        inv_s = scalars_ref[0]
        out_zp = scalars_ref[1]
        q = jnp.round(y * inv_s) + out_zp
        out_ref[...] = jnp.clip(q, -128.0, 127.0).astype(out_ref.dtype)
    else:
        out_ref[...] = y.astype(out_ref.dtype)


def qlinear(inp_q, weight_q, bias, inp_scale, inp_zero_point,
            weight_scales, weight_zero_points, output_dtype=jnp.float32,
            output_scale=None, output_zero_point=None, *, tm=256, tn=256):
    """QDQ linear: y = deq(inp_q) @ deq(weight_q).T + bias  [-> requant]."""
    M, K = inp_q.shape
    N, K2 = weight_q.shape
    assert K == K2

    # Clamp tiles to the (padded) problem size; keep int8-friendly multiples.
    tm = min(tm, _round_up(M, 32))
    tn = min(tn, _round_up(N, 128))
    M_p = _round_up(M, tm)
    N_p = _round_up(N, tn)

    # Pad ragged dims; padded rows/cols are sliced off the output afterwards.
    x_p = jnp.pad(inp_q, ((0, M_p - M), (0, 0))) if M_p != M else inp_q
    w_p = jnp.pad(weight_q, ((0, N_p - N), (0, 0))) if N_p != N else weight_q

    ws = weight_scales.astype(jnp.float32).reshape(N)
    wzp = weight_zero_points.astype(jnp.float32).reshape(N)
    b = bias.astype(jnp.float32).reshape(N)
    if N_p != N:
        ws = jnp.pad(ws, (0, N_p - N), constant_values=1.0)
        wzp = jnp.pad(wzp, (0, N_p - N))
        b = jnp.pad(b, (0, N_p - N))

    inp_scale = jnp.float32(inp_scale)
    inp_zp = jnp.float32(inp_zero_point)

    # Fold all quant params into per-channel epilogue constants (computed once).
    colsum_w = jnp.sum(w_p.astype(jnp.int32), axis=1).astype(jnp.float32)  # [N_p]
    fs = inp_scale * ws                                                    # [N_p]
    a_scale = fs.reshape(1, N_p)
    r_scale = (fs * wzp).reshape(1, N_p)
    o_bias = (b + fs * (K * inp_zp * wzp - inp_zp * colsum_w)).reshape(1, N_p)

    with_requant = output_scale is not None
    inv_out_scale = (jnp.float32(1.0) / jnp.float32(output_scale)
                     if with_requant else jnp.float32(1.0))
    out_zp = (jnp.float32(output_zero_point)
              if with_requant else jnp.float32(0.0))
    scalars = jnp.stack([inv_out_scale, out_zp]).astype(jnp.float32)

    out_dtype = jnp.int8 if with_requant else output_dtype
    kernel = functools.partial(_qlinear_kernel, with_requant=with_requant)

    grid = (M_p // tm, N_p // tn)

    # VMEM budget for the chosen tiles (double-buffered int8 in, bf16/f32 temps,
    # double-buffered out) with headroom; capped at 64 MiB for v7x portability.
    out_size = jnp.dtype(out_dtype).itemsize
    est = (2 * (tm * K + tn * K) * 4          # int8 blocks + bf16/f32 temps
           + 2 * tm * tn * (out_size + 4)     # output blocks + f32 accumulator
           + 6 * tn * 4)                      # per-channel epilogue params
    vmem_limit = int(min(64 * 1024 * 1024, max(32 * 1024 * 1024, 2 * est)))

    out_p = pl.pallas_call(
        kernel,
        out_shape=jax.ShapeDtypeStruct((M_p, N_p), out_dtype),
        grid_spec=pltpu.PrefetchScalarGridSpec(
            num_scalar_prefetch=0,
            grid=grid,
            in_specs=[
                pl.BlockSpec(memory_space=pltpu.SMEM),            # requant scalars
                pl.BlockSpec((tm, K), lambda i, j: (i, 0)),       # x tile (int8)
                pl.BlockSpec((tn, K), lambda i, j: (j, 0)),       # w tile (int8, [N,K])
                pl.BlockSpec((1, tn), lambda i, j: (0, j)),       # a_scale
                pl.BlockSpec((1, tn), lambda i, j: (0, j)),       # r_scale
                pl.BlockSpec((1, tn), lambda i, j: (0, j)),       # o_bias
            ],
            out_specs=pl.BlockSpec((tm, tn), lambda i, j: (i, j)),
        ),
        compiler_params=pltpu.CompilerParams(
            dimension_semantics=("parallel", "parallel"),
            vmem_limit_bytes=vmem_limit),
    )(scalars, x_p, w_p, a_scale, r_scale, o_bias)

    if M_p != M or N_p != N:
        out_p = out_p[:M, :N]
    return out_p


def _quantize(x, scale, zp, dtype=jnp.int8):
    q = jnp.round(x / scale) + zp
    return jnp.clip(q, -128, 127).astype(dtype)


if __name__ == "__main__":
    key = jax.random.PRNGKey(0)
    k_in, k_w, k_b, k_zp = jax.random.split(key, 4)

    # batch=2, seq=100 -> M=200 tokens; in_features=128, out_features=384.
    # M is deliberately not a tile multiple to exercise the padding path.
    M, K, N = 200, 128, 384

    inp_f32 = jax.random.normal(k_in, (M, K), jnp.float32)
    w_f32 = jax.random.normal(k_w, (N, K), jnp.float32) * 0.1
    bias = jax.random.normal(k_b, (N,), jnp.float32)

    # Deterministic quantization parameters (nonzero zero-points on both sides
    # so every correction term in the epilogue is exercised).
    inp_scale = jnp.float32(0.05)
    inp_zp = jnp.float32(3.0)
    weight_scales = 0.005 + 0.0001 * jnp.arange(N, dtype=jnp.float32)
    weight_zps = jnp.round(jax.random.uniform(k_zp, (N,), jnp.float32, -3.0, 3.0))

    inp_q = _quantize(inp_f32, inp_scale, inp_zp)                       # int8 [M,K]
    w_q = _quantize(w_f32, weight_scales[:, None], weight_zps[:, None])  # int8 [N,K]

    # Pure-JAX reference (qdq_linear semantics).
    x_deq = (inp_q.astype(jnp.float32) - inp_zp) * inp_scale
    w_deq = (w_q.astype(jnp.float32) - weight_zps[:, None]) * weight_scales[:, None]
    ref = jnp.dot(x_deq, w_deq.T, precision=jax.lax.Precision.HIGHEST) + bias

    # ---- Path 1: fp32 output (output_scales=None) ----
    out = qlinear(inp_q, w_q, bias, inp_scale, inp_zp,
                  weight_scales, weight_zps, output_dtype=jnp.float32,
                  tm=128, tn=128)
    out = jax.block_until_ready(out)
    assert out.shape == (M, N)
    assert jnp.allclose(out, ref, atol=1e-2, rtol=1e-3), (
        float(jnp.max(jnp.abs(out - ref))))

    # ---- Path 2: requantized int8 output (output_scales given) ----
    out_scale = jnp.float32(0.1)
    out_zp = jnp.float32(1.0)
    out_q = qlinear(inp_q, w_q, bias, inp_scale, inp_zp,
                    weight_scales, weight_zps, output_dtype=jnp.int8,
                    output_scale=out_scale, output_zero_point=out_zp,
                    tm=128, tn=128)
    out_q = jax.block_until_ready(out_q)
    ref_q = jnp.clip(jnp.round(ref / out_scale) + out_zp, -128, 127).astype(jnp.int8)
    max_q_diff = int(jnp.max(jnp.abs(out_q.astype(jnp.int32) - ref_q.astype(jnp.int32))))
    assert max_q_diff <= 1, max_q_diff

    print("KERNEL_OK")
</pallas_src>

<mosaic_0001>
module attributes {stable_mosaic.version = 11 : i64} {
  func.func @_qlinear_kernel(%arg0: i32, %arg1: i32, %arg2: memref<2xf32, #tpu.memory_space<smem>>, %arg3: memref<128x128xi8, #tpu.memory_space<vmem>>, %arg4: memref<128x128xi8, #tpu.memory_space<vmem>>, %arg5: memref<1x128xf32, #tpu.memory_space<vmem>>, %arg6: memref<1x128xf32, #tpu.memory_space<vmem>>, %arg7: memref<1x128xf32, #tpu.memory_space<vmem>>, %arg8: memref<128x128xf32, #tpu.memory_space<vmem>>) attributes {dimension_semantics = [#tpu.dimension_semantics<parallel>, #tpu.dimension_semantics<parallel>], iteration_bounds = array<i64: 2, 3>, scalar_prefetch = 0 : i64, scratch_operands = 0 : i64, tpu.core_type = #tpu.core_type<tc>, window_params = [{transform_indices = @transform_0, window_bounds = array<i64: 2>}, {transform_indices = @transform_1, window_bounds = array<i64: 128, 128>}, {transform_indices = @transform_2, window_bounds = array<i64: 128, 128>}, {transform_indices = @transform_3, window_bounds = array<i64: 1, 128>}, {transform_indices = @transform_4, window_bounds = array<i64: 1, 128>}, {transform_indices = @transform_5, window_bounds = array<i64: 1, 128>}, {transform_indices = @transform_6, window_bounds = array<i64: 128, 128>}]} {
    %c0 = arith.constant 0 : index
    %c0_0 = arith.constant 0 : index
    %0 = vector.load %arg3[%c0, %c0_0] : memref<128x128xi8, #tpu.memory_space<vmem>>, vector<128x128xi8>
    %1 = arith.sitofp %0 : vector<128x128xi8> to vector<128x128xf32>
    %2 = arith.truncf %1 : vector<128x128xf32> to vector<128x128xbf16>
    %c0_1 = arith.constant 0 : index
    %c0_2 = arith.constant 0 : index
    %3 = vector.load %arg4[%c0_1, %c0_2] : memref<128x128xi8, #tpu.memory_space<vmem>>, vector<128x128xi8>
    %4 = arith.sitofp %3 : vector<128x128xi8> to vector<128x128xf32>
    %5 = arith.truncf %4 : vector<128x128xf32> to vector<128x128xbf16>
    %cst = arith.constant dense<0.000000e+00> : vector<128x128xf32>
    %6 = tpu.matmul %2, %5, %cst {dimension_numbers = #tpu.dot_dimension_numbers<[1], [1], [0], [0], [0, 0, 1, 0], [], []>} : vector<128x128xbf16>, vector<128x128xbf16>, vector<128x128xf32> -> vector<128x128xf32>
    %cst_3 = arith.constant dense<0.000000e+00> : vector<128xf32>
    %7 = vector.multi_reduction <add>, %1, %cst_3 [1] : vector<128x128xf32> to vector<128xf32>
    %8 = vector.shape_cast %7 : vector<128xf32> to vector<128x1xf32>
    %c0_4 = arith.constant 0 : index
    %c0_5 = arith.constant 0 : index
    %9 = vector.load %arg5[%c0_4, %c0_5] : memref<1x128xf32, #tpu.memory_space<vmem>>, vector<1x128xf32>
    %10 = vector.broadcast %9 : vector<1x128xf32> to vector<128x128xf32>
    %11 = arith.mulf %6, %10 : vector<128x128xf32>
    %c0_6 = arith.constant 0 : index
    %c0_7 = arith.constant 0 : index
    %12 = vector.load %arg6[%c0_6, %c0_7] : memref<1x128xf32, #tpu.memory_space<vmem>>, vector<1x128xf32>
    %13 = vector.broadcast %8 : vector<128x1xf32> to vector<128x128xf32>
    %14 = vector.broadcast %12 : vector<1x128xf32> to vector<128x128xf32>
    %15 = arith.mulf %13, %14 : vector<128x128xf32>
    %16 = arith.subf %11, %15 : vector<128x128xf32>
    %c0_8 = arith.constant 0 : index
    %c0_9 = arith.constant 0 : index
    %17 = vector.load %arg7[%c0_8, %c0_9] : memref<1x128xf32, #tpu.memory_space<vmem>>, vector<1x128xf32>
    %18 = vector.broadcast %17 : vector<1x128xf32> to vector<128x128xf32>
    %19 = arith.addf %16, %18 : vector<128x128xf32>
    %c0_10 = arith.constant 0 : index
    %c0_11 = arith.constant 0 : index
    %20 = vector.load %arg8[%c0_10, %c0_11] : memref<128x128xf32, #tpu.memory_space<vmem>>, vector<128x128xf32>
    tpu.vector_store %arg8[%c0_10, %c0_11], %19 {strides = array<i32>} : memref<128x128xf32, #tpu.memory_space<vmem>>, vector<128x128xf32>,
    return
  }
  func.func @transform_0(%arg0: i32, %arg1: i32) -> i32 {
    %c0_i32 = arith.constant 0 : i32
    %c0_i32_0 = arith.constant 0 : i32
    return %c0_i32 : i32
  }
  func.func @transform_1(%arg0: i32, %arg1: i32) -> (i32, i32) {
    %c0_i32 = arith.constant 0 : i32
    %c0_i32_0 = arith.constant 0 : i32
    return %arg0, %c0_i32 : i32, i32
  }
  func.func @transform_2(%arg0: i32, %arg1: i32) -> (i32, i32) {
    %c0_i32 = arith.constant 0 : i32
    %c0_i32_0 = arith.constant 0 : i32
    return %arg1, %c0_i32 : i32, i32
  }
  func.func @transform_3(%arg0: i32, %arg1: i32) -> (i32, i32) {
    %c0_i32 = arith.constant 0 : i32
    %c0_i32_0 = arith.constant 0 : i32
    return %c0_i32, %arg1 : i32, i32
  }
  func.func @transform_4(%arg0: i32, %arg1: i32) -> (i32, i32) {
    %c0_i32 = arith.constant 0 : i32
    %c0_i32_0 = arith.constant 0 : i32
    return %c0_i32, %arg1 : i32, i32
  }
  func.func @transform_5(%arg0: i32, %arg1: i32) -> (i32, i32) {
    %c0_i32 = arith.constant 0 : i32
    %c0_i32_0 = arith.constant 0 : i32
    return %c0_i32, %arg1 : i32, i32
  }
  func.func @transform_6(%arg0: i32, %arg1: i32) -> (i32, i32) {
    %c0_i32 = arith.constant 0 : i32
    return %arg0, %arg1 : i32, i32
  }
}

</mosaic_0001>

<bundles_post_ra>
// kernel: tpu_custom_call.1
= control target key start
LH: loop header
LB: loop body
LE: loop exit
PB: predicated region body
PF: predicated region fallthrough
CT: control target
= control target key end

     0   :  { %s1859_s0 = inlined_call_operand.hbm [shape: f32[2], index: 0, kind: input, shape index: {}]   ;;  %s1860_s1 = inlined_call_operand.hbm [shape: s8[256,128], index: 1, kind: input, shape index: {}]   ;;  %s1861_s2 = inlined_call_operand.hbm [shape: s8[384,128], index: 2, kind: input, shape index: {}]   ;;  %s1862_s3 = inlined_call_operand.vmem [shape: f32[1,384], index: 3, kind: input, shape index: {}]   ;;  %s1863_s4 = inlined_call_operand.vmem [shape: f32[1,384], index: 4, kind: input, shape index: {}]   ;;  %s1864_s5 = inlined_call_operand.vmem [shape: f32[1,384], index: 5, kind: input, shape index: {}]   ;;  %s1865_s6 = inlined_call_operand.hbm [shape: f32[256,384], index: 6, kind: output, shape index: {}]  }
   0x1   :  { %1882 = sst [smem:[#allocation21_spill]] %s1859_s0 }
   0x2   :  { %1883 = sst [smem:[#allocation22_spill]] %s1860_s1 }
   0x3   :  { %1884 = sst [smem:[#allocation23_spill]] %s1862_s3 }
   0x4   :  { %1885 = sst [smem:[#allocation24_spill]] %s1863_s4 }
   0x5   :  { %1886 = sst [smem:[#allocation25_spill]] %s1864_s5 }
   0x6   :  { %1887 = sst [smem:[#allocation26_spill]] %s1865_s6 }
   0x7   :  { %11 = vsyncpa [#allocation5], 0 }
   0x8   :  { %12 = vsyncpa [#allocation3], 0 }
   0x9   :  { %14 = vsyncpa [#allocation3 + $0x1], 0 }
   0xa   :  { %15 = vsyncpa [#allocation8], 0 }
   0xb   :  { %17 = vsyncpa [#allocation8 + $0x1], 0 }
   0xc   :  { %18 = vsyncpa [#allocation4], 0 }
   0xd   :  { %20 = vsyncpa [#allocation4 + $0x1], 0  ;;  %s1344_s21 = smov 0   ;;  %s1346_s22 = smov 0  }
   0xe   :  { %s1348_s23 = smov 0   ;;  %s1350_s24 = smov 0  }
   0xf   :  { %s1352_s25 = smov 0   ;;  %s1354_s26 = smov 0  }
  0x10   :  { %s1356_s27 = smov 0   ;;  %s1358_s28 = smov 0  }
  0x11   :  { %s1360_s29 = smov 0   ;;  %s1362_s30 = smov 0  }
  0x12   :  { %s1364_s7 = smov 0   ;;  %s1366_s8 = smov 0  }
  0x13   :  { %s1368_s9 = smov 0   ;;  %s1370_s10 = smov 0  }
  0x14 LB: > { %1888 = sst [smem:[#allocation14_spill]] %s1246_s21  ;;  %s832_s11 = sadd.s32 4294967295, %s1298_s10   ;;  %s1298_s10 = sphi %s1370_s10, %s26_s10   ;;  %s1294_s9 = sphi %s1368_s9, %s1942_s9   ;;  %s1290_s8 = sphi %s1366_s8, %s1930_s8   ;;  %s1286_s7 = sphi %s1364_s7, %s1941_s7   ;;  %s1282_s30 = sphi %s1362_s30, %s1929_s30   ;;  %s1278_s29 = sphi %s1360_s29, %s1940_s29   ;;  %s1274_s28 = sphi %s1358_s28, %s1939_s28   ;;  %s1270_s27 = sphi %s1356_s27, %s1938_s27   ;;  %s1266_s26 = sphi %s1354_s26, %s1937_s26   ;;  %s1262_s25 = sphi %s1352_s25, %s1936_s25   ;;  %s1258_s24 = sphi %s1350_s24, %s1935_s24   ;;  %s1254_s23 = sphi %s1348_s23, %s1934_s23   ;;  %s1250_s22 = sphi %s1346_s22, %s1933_s22   ;;  %s1246_s21 = sphi %s1344_s21, %s1932_s21  }
  0x15   : > { %1889 = sst [smem:[#allocation15_spill]] %s1286_s7  ;;  %s833_s12 = sadd.s32 4294967294, %s1298_s10  }
  0x16   : > { %1890 = sst [smem:[#allocation16_spill]] %s1290_s8  ;;  %p79_p0 = scmp.ne.s32.totalorder %s1274_s28, %s1270_s27 }
  0x17   : > { %p1413_p1 = scmp.eq.s32.totalorder %s832_s11, 0  ;;  %p105_p2 = scmp.ne.s32.totalorder %s1262_s25, %s1258_s24 }
  0x18   : > { %p208_p4 = scmp.ne.s32.totalorder %s1254_s23, %s1250_s22  ;;  %p209_p6 = scmp.eq.s32.totalorder %s832_s11, 5 }
  0x19   : > { %s1891_s13 = scalar_select %p1413_p1, 1, 0 }
  0x1a   : > { %p1421_p3 = por %p1413_p1, %p79_p0  ;;  %p1429_p5 = por %p105_p2, %p1413_p1 }
  0x1b   : > { %p214_p7 = scmp.ne.s32.totalorder %s1250_s22, %s1246_s21  ;;  %p215_p8 = scmp.eq.s32.totalorder %s833_s12, 5 }
  0x1c   : > { %s1892_s15 = scalar_select %p1421_p3, 1, 0 }
  0x1d   : > { %s1893_s16 = scalar_select %p1429_p5, 1, 0 }
  0x1e   : > { %p1435_p9 = por %p209_p6, %p208_p4  ;;  %p834_p10 = scmp.ge.s32.totalorder %s1298_s10, 1 }
  0x1f   : > { %p1440_p11 = por %p215_p8, %p214_p7  ;;  %p222_p12 = scmp.lt.s32.totalorder %s1298_s10, 7 }
  0x20   : > { %s1894_s17 = scalar_select %p1435_p9, 1, 0 }
  0x21   : > { %s1896_s18 = scalar_select %p1440_p11, 1, 0 }
  0x22   : > { %1895 = sst [smem:[#allocation17_spill]] %s1894_s17  ;;  %p1445_p13 = pnand %p834_p10, %p222_p12 }
  0x23   : > { %1897 = sst [smem:[#allocation18_spill]] %s1896_s18  ;;  %p73_p4 = scmp.ne.s32.totalorder %s1278_s29, %s1274_s28 }
  0x24   : > { %p934_p0 = pneg %p1445_p13  ;;  %p1873_p6 = scmp.eq.s32.totalorder %s1298_s10, 0 }
  0x25   : > { %p1872_p7 = scmp.lt.s32.totalorder %s1298_s10, 6  ;;  %s1900_s0 = sld [smem:[#allocation21_spill]] }
  0x26   : > { %p1454_p2 = pnand %p934_p0, %p1413_p1 }
  0x28   : > { %p1073_p10 = pneg %p1454_p2 }
  0x2b   : > { %s1071_s14 = scalar_lea.hbm %s1900_s0, 16 }
  0x2c   : > { %p1072_p8 = scmp.ne.s32.totalorder %s1900_s0, %s1071_s14  ;;  %p1078_p11 = scmp.lt.u32.totalorder %s1071_s14, %s1900_s0 }
  0x2e   : > { %p1074_p12 = pnand %p1073_p10, %p1072_p8 }
  0x30   : > { %p1075_p0 = pneg %p1074_p12 }
  0x32   : > { %p1080_p9 = pnand %p1078_p11, %p1075_p0 }
  0x34   : > { %1083 = shalt.err (!%p1080_p9)
}
  0x35   : > { %s1300_s27 = smov [#allocation2]   ;;  %p75_p8 = por %p1873_p6, %p73_p4 }
  0x36   : > { %937 = dma.hbm_to_smem (!%p1454_p2), %s1900_s0, 16, %s1300_s27, [#allocation5]  }
  0x37   : > { %s244_s21 = sand.u32 1, %s1278_s29   ;;  %s857_s17 = sshll.u32 %s1294_s9, 9 }
  0x38   : > { %s837_s14 = sshll.u32 %s244_s21, 5  ;;  %s1901_s1 = sld [smem:[#allocation22_spill]] }
  0x39   : > { %s248_s6 = scalar_lea.vmem [#allocation6], %s837_s14  ;;  %p1495_p9 = pnand %p1872_p7, %p75_p8 }
  0x3a   : > { %s255_s12 = sshll.u32 %s248_s6, 4  ;;  %s1499_s11 = scalar_lea.sflag [#allocation3], %s244_s21  ;;  %s1491_s12 = int_to_ptr.vmem [resolvable:$true] %s255_s12 }
  0x3b   : > { %p1086_p2 = pneg %p1495_p9 }
  0x3e   : > { %s1489_s24 = scalar_lea.hbm %s1901_s1, %s857_s17  ;;  %s1089_s20 = scalar_lea.hbm %s1901_s1, 1024 }
  0x3f   : > { %s1084_s18 = scalar_lea.hbm %s1489_s24, 512  ;;  %p1090_p12 = scmp.lt.u32.totalorder %s1489_s24, %s1901_s1 }
  0x40   : > { %p1085_p11 = scmp.ne.s32.totalorder %s1489_s24, %s1084_s18  ;;  %p1091_p0 = scmp.lt.u32.totalorder %s1089_s20, %s1084_s18 }
  0x41   : > { %p1093_p7 = scmp.lt.u32.totalorder %s1084_s18, %s1489_s24 }
  0x42   : > { %p1087_p4 = pnand %p1086_p2, %p1085_p11  ;;  %p1092_p8 = por %p1091_p0, %p1090_p12 }
  0x44   : > { %p1088_p10 = pneg %p1087_p4  ;;  %p1094_p6 = por %p1093_p7, %p1092_p8 }
  0x46   : > { %p1095_p5 = pnand %p1094_p6, %p1088_p10 }
  0x48   : > { %1098 = shalt.err (!%p1095_p5)
}
  0x49   : > { %s1099_s21 = scalar_lea.vmem %s1491_s12, 512  ;;  %s1301_s14 = smov [#allocation6]  }
  0x4a   : > { %p1100_p11 = scmp.ne.s32.totalorder %s1491_s12, %s1099_s21  ;;  %s1104_s17 = sshll.u32 %s1301_s14, 4  ;;  %s1105_s17 = int_to_ptr.vmem [resolvable:$false] %s1104_s17 }
  0x4b   : > { %s1106_s0 = scalar_lea.vmem %s1105_s17, 1024  ;;  %p1107_p1 = scmp.lt.s32.totalorder %s1491_s12, %s1105_s17 }
  0x4c   : > { %p1102_p4 = pnand %p1100_p11, %p1086_p2  ;;  %p1108_p12 = scmp.lt.s32.totalorder %s1106_s0, %s1099_s21 }
  0x4e   : > { %p1103_p3 = pneg %p1102_p4  ;;  %p1109_p0 = por %p1108_p12, %p1107_p1 }
  0x50   : > { %p1110_p7 = pnand %p1109_p0, %p1103_p3 }
  0x52   : > { %1113 = shalt.err (!%p1110_p7)
}
  0x53   : > { %s1878_s18 = smov 128   ;;  %s1879_s20 = smov 8  }
  0x54   : > { %941 = dma.hbm_to_vmem [thread:$0]  (!%p1495_p9), %s1489_s24, 512, %s1491_s12, %s1499_s11, %s1878_s18, %s1878_s18, %s1879_s20  }
  0x55   : > { %s92_s6 = sadd.s32 1, %s1266_s26  ;;  %s35_s21 = sadd.s32 1, %s1290_s8 }
  0x56   : > { %p99_p1 = scmp.ne.s32.totalorder %s1266_s26, %s1262_s25  ;;  %p36_p3 = scmp.ge.s32.totalorder %s35_s21, 3 }
  0x57   : > { %s265_s14 = sand.u32 1, %s1266_s26   ;;  %p1903_p5 = scmp.eq.s32.totalorder %s1298_s10, 0 }
  0x58   : > { %s1944_s21 = smov (%p36_p3, %s35_s21), 0  ;;  %s1906_s0 = sadd.s32 1, %s1294_s9 }
  0x59   : > { %p1537_p6 = por %p99_p1, %p1903_p5  ;;  %1905 = sst [smem:[#allocation19_spill]] %s1944_s21 }
  0x5a   : > { %s1946_s0 = smov (!%p36_p3, %s1906_s0), %s1294_s9  ;;  %s89_s24 = ssub.s32 %s1290_s8, %s1944_s21 }
  0x5b   : > { %s840_s12 = sshll.u32 %s265_s14, 5  ;;  %p40_p9 = scmp.ge.s32.totalorder %s1946_s0, 2 }
  0x5c   : > { %p90_p2 = scmp.eq.s32.totalorder %s89_s24, 0  ;;  %s858_s27 = sshll.u32 %s1290_s8, 9 }
  0x5d   : > { %s1948_s0 = smov (%p40_p9, %s1946_s0), 0  ;;  %s1559_s7 = scalar_lea.hbm %s1861_s2, %s858_s27 }
  0x5e   : > { %s1552_s11 = scalar_select %p90_p2, %s1266_s26, %s92_s6  }
  0x5f   : > { %s63_s18 = ssub.s32 %s1294_s9, %s1948_s0  ;;  %s269_s5 = scalar_lea.vmem [#allocation7], %s840_s12 }
  0x60   : > { %1907 = sst [smem:[#allocation20_spill]] %s1552_s11  ;;  %p64_p10 = scmp.eq.s32.totalorder %s63_s18, 0 }
  0x61   : > { %s195_s21 = sor.u32 %s89_s24, %s63_s18  ;;  %s276_s8 = sshll.u32 %s269_s5, 4  ;;  %s1571_s8 = int_to_ptr.vmem [resolvable:$true] %s276_s8 }
  0x62   : > { %p196_p8 = scmp.eq.s32.totalorder %s195_s21, 0  ;;  %s1908_s3 = sadd.s32 1, %s1278_s29 }
  0x63   : > { %s1564_s4 = scalar_select %p64_p10, %s1278_s29, %s1908_s3  }
  0x64   : > { %s1909_s6 = sadd.s32 1, %s1254_s23  ;;  %p1910_p11 = scmp.lt.s32.totalorder %s1298_s10, 6 }
  0x65   : > { %s1569_s11 = scalar_select %p196_p8, %s1254_s23, %s1909_s6  }
  0x66   : > { %p1577_p4 = pnand %p1910_p11, %p1537_p6  ;;  %s1581_s18 = scalar_lea.sflag [#allocation8], %s265_s14 }
  0x67   : > { %s1114_s20 = scalar_lea.hbm %s1559_s7, 512  ;;  %s1119_s21 = scalar_lea.hbm %s1861_s2, 1536 }
  0x68   : > { %p1115_p12 = scmp.ne.s32.totalorder %s1559_s7, %s1114_s20  ;;  %p1116_p0 = pneg %p1577_p4 }
  0x69   : > { %p1120_p3 = scmp.lt.u32.totalorder %s1559_s7, %s1861_s2  ;;  %p1121_p5 = scmp.lt.u32.totalorder %s1119_s21, %s1114_s20 }
  0x6a   : > { %p1117_p7 = pnand %p1116_p0, %p1115_p12  ;;  %p1123_p9 = scmp.lt.u32.totalorder %s1114_s20, %s1559_s7 }
  0x6b   : > { %p1122_p6 = por %p1121_p5, %p1120_p3 }
  0x6c   : > { %p1118_p1 = pneg %p1117_p7 }
  0x6d   : > { %p1124_p2 = por %p1123_p9, %p1122_p6 }
  0x6f   : > { %p1125_p10 = pnand %p1124_p2, %p1118_p1 }
  0x71   : > { %1128 = shalt.err (!%p1125_p10)
}
  0x72   : > { %s1129_s14 = scalar_lea.vmem %s1571_s8, 512  ;;  %s1304_s12 = smov [#allocation7]  }
  0x73   : > { %p1130_p8 = scmp.ne.s32.totalorder %s1571_s8, %s1129_s14  ;;  %s1134_s27 = sshll.u32 %s1304_s12, 4  ;;  %s1135_s27 = int_to_ptr.vmem [resolvable:$false] %s1134_s27 }
  0x74   : > { %s1136_s6 = scalar_lea.vmem %s1135_s27, 1024  ;;  %p1137_p7 = scmp.lt.s32.totalorder %s1571_s8, %s1135_s27 }
  0x75   : > { %p1132_p11 = pnand %p1130_p8, %p1116_p0  ;;  %p1138_p3 = scmp.lt.s32.totalorder %s1136_s6, %s1129_s14 }
  0x77   : > { %p1133_p12 = pneg %p1132_p11  ;;  %p1139_p5 = por %p1138_p3, %p1137_p7 }
  0x79   : > { %p1140_p6 = pnand %p1139_p5, %p1133_p12 }
  0x7b   : > { %1143 = shalt.err (!%p1140_p6)
}
  0x7c   : > { %s1912_s20 = smov 8   ;;  %s1913_s3 = smov 128  }
  0x7d   : > { %944 = dma.hbm_to_vmem [thread:$0]  (!%p1577_p4), %s1559_s7, 512, %s1571_s8, %s1581_s18, %s1913_s3, %s1913_s3, %s1912_s20  }
  0x7e   : > { %306 = sbr.rel (%p1445_p13) target bundleno = 456 (0x1c8), region = 44  ;;  %p1914_p0 = scmp.ne.s32.totalorder (!%p1445_p13), %s1891_s13, 0 }
  0x85   : > { %1229 = dma.done.wait (%p1914_p0), [#allocation5], 16  }
  0x86   : > { %1231 = vsyncadd (%p1914_p0), [#allocation5], 4294967280  ;;  %s312_s5 = sand.u32 1, %s1274_s28   ;;  %p1915_p1 = scmp.ne.s32.totalorder %s1892_s15, 0 }
  0x87   : > { %s845_s1 = sshll.u32 %s312_s5, 5  ;;  %s313_s21 = scalar_lea.sflag [#allocation3], %s312_s5 }
  0x88   : > { %s1619_s17 = scalar_lea.vmem [#allocation6], %s845_s1 }
  0x89   : > { %1233 = dma.done.wait (%p1915_p1), %s313_s21, 512  }
  0x8a   : > { %1235 = vsyncadd (%p1915_p1), %s313_s21, 4294966784  ;;  %s321_s7 = sand.u32 1, %s1262_s25   ;;  %p1916_p13 = scmp.ne.s32.totalorder %s1893_s16, 0 }
  0x8b   : > { %s846_s8 = sshll.u32 %s321_s7, 5  ;;  %s322_s19 = scalar_lea.sflag [#allocation8], %s321_s7 }
  0x8c   : > { %s1626_s18 = scalar_lea.vmem [#allocation7], %s846_s8 }
  0x8d   : > { %1237 = dma.done.wait (%p1916_p13), %s322_s19, 512  }
  0x8e   : > { %1239 = vsyncadd (%p1916_p13), %s322_s19, 4294966784 }
  0x8f   : > { %330 = sfence }
  0x90   : > { %v426_v0 = vld [vmem:[%s1626_s18] sm:$0xff]  ;;  %v1637_v4 = vld [vmem:[%s1619_s17 + $0x10] sm:$0xff]  ;;  %v427_v9 = vld [vmem:[%s1626_s18 + $0x8] sm:$0xff]  ;;  %p371_p4 = scmp.lt.s32.totalorder %s1282_s30, 2  ;;  %s1917_s24 = sld [smem:[#allocation24_spill]] }
  0x91   : > { %v430_v1 = vunpack.c.l.s8.bf16 %v426_v0  ;;  %v431_v2 = vunpack.c.h.s8.bf16 %v426_v0  ;;  %v1634_v3 = vld [vmem:[%s1619_s17] sm:$0xff]  ;;  %v422_v6 = vunpack.c.l.s8.bf16 %v1637_v4  ;;  %v432_v14 = vunpack.c.l.s8.bf16 %v427_v9  ;;  %v1647_v15 = vld [vmem:[%s1619_s17 + $0x8] sm:$0xff]  ;;  %v428_v29 = vld [vmem:[%s1626_s18 + $0x10] sm:$0xff]  ;;  %s1918_s6 = sld [smem:[#allocation23_spill]]  ;;  %s366_s3 = sand.u32 1, %s1250_s22  }
  0x92   : > { %v418_v5 = vunpack.c.l.s8.bf16 %v1634_v3  ;;  %v386_v7 = vunpack.c.0.s8 %v1634_v3  ;;  %v388_v8 = vunpack.c.2.s8 %v1634_v3  ;;  %v387_v10 = vunpack.c.1.s8 %v1634_v3  ;;  %v385_v35 = vld [vmem:[%s1619_s17 + $0x18] sm:$0xff]  ;;  %s372_s13 = scalar_select %p371_p4, %s1282_s30, 2 }
  0x93   : > { %875 = vmatprep.subr.bf16.mxu0 %v430_v1  ;;  %907 = vmatprep.subr.bf16.mxu1 %v430_v1  ;;  %v389_v11 = vunpack.c.3.s8 %v1634_v3  ;;  %v390_v18 = vunpack.c.0.s8 %v1647_v15  ;;  %v391_v19 = vunpack.c.1.s8 %v1647_v15  ;;  %v392_v22 = vunpack.c.2.s8 %v1647_v15  ;;  %v429_v47 = vld [vmem:[%s1626_s18 + $0x18] sm:$0xff]  ;;  %s1919_s21 = sld [smem:[#allocation25_spill]]  ;;  %s1697_s7 = sshll.u32 %s366_s3, 7 }
  0x94   : > { %876 = vmatpush3.bf16.xpose.msra.mxu0 %v430_v1  ;;  %915 = vmatpush3.bf16.xpose.msra.mxu1 %v430_v1  ;;  %v402_v12 = vcvt.s32.f32 %v386_v7  ;;  %v404_v13 = vcvt.s32.f32 %v388_v8  ;;  %v403_v16 = vcvt.s32.f32 %v387_v10  ;;  %v393_v23 = vunpack.c.3.s8 %v1647_v15  ;;  %s1920_s8 = sld [smem:[#allocation15_spill]]  ;;  %s1719_s18 = scalar_lea.vmem [#allocation9], %s1697_s7 }
  0x95   : > { %877 = vmatprep.subr.bf16.mxu0 %v431_v2  ;;  %908 = vmatprep.subr.bf16.mxu1 %v431_v2  ;;  %v405_v17 = vcvt.s32.f32 %v389_v11  ;;  %v406_v20 = vcvt.s32.f32 %v390_v18  ;;  %v407_v21 = vcvt.s32.f32 %v391_v19  ;;  %v433_v24 = vunpack.c.h.s8.bf16 %v427_v9  ;;  %s684_s15 = sshll.u32 %s1719_s18, 4  ;;  %s1922_s27 = sld [smem:[#allocation17_spill]]  ;;  %s1771_s15 = int_to_ptr.vmem [resolvable:$true] %s684_s15 }
  0x96   : > { %891 = vmatprep.mubr.bf16.mxu0 %v418_v5  ;;  %899 = vmatprep.mubr.bf16.mxu1 %v422_v6  ;;  %v408_v25 = vcvt.s32.f32 %v392_v22  ;;  %v409_v26 = vcvt.s32.f32 %v393_v23  ;;  %v394_v27 = vunpack.c.0.s8 %v1637_v4  ;;  %v395_v28 = vunpack.c.1.s8 %v1637_v4  ;;  %s376_s14 = scalar_lea.vmem %s1917_s24, %s372_s13  ;;  %s1305_s5 = smov [#allocation9]  }
  0x97   : > { %535 = vadd.xlane.f32.xlu0 %v402_v12  ;;  %539 = vadd.xlane.f32.xlu1 %v404_v13  ;;  %v396_v32 = vunpack.c.2.s8 %v1637_v4  ;;  %v397_v33 = vunpack.c.3.s8 %v1637_v4  ;;  %v434_v34 = vunpack.c.l.s8.bf16 %v428_v29  ;;  %v398_v38 = vunpack.c.0.s8 %v385_v35  ;;  %s373_s20 = scalar_lea.vmem %s1918_s6, %s372_s13  ;;  %s1783_s6 = scalar_lea.sflag [#allocation4], %s366_s3 }
  0x98   : > { %v410_v30 = vcvt.s32.f32 %v394_v27  ;;  %v411_v31 = vcvt.s32.f32 %v395_v28  ;;  %v399_v39 = vunpack.c.1.s8 %v385_v35  ;;  %v400_v42 = vunpack.c.2.s8 %v385_v35  ;;  %v1681_v5 = vld [vmem:[%s373_s20] ss:$0 sm:$0xff]  ;;  %s1144_s20 = scalar_lea.vmem %s1771_s15, 2048  ;;  %s1148_s1 = sshll.u32 %s1305_s5, 4  ;;  %s1149_s1 = int_to_ptr.vmem [resolvable:$false] %s1148_s1 }
  0x99   : > { %v412_v36 = vcvt.s32.f32 %v396_v32  ;;  %v413_v37 = vcvt.s32.f32 %v397_v33  ;;  %v414_v40 = vcvt.s32.f32 %v398_v38  ;;  %v401_v43 = vunpack.c.3.s8 %v385_v35  ;;  %s379_s17 = scalar_lea.vmem %s1919_s21, %s372_s13  ;;  %p1145_p9 = scmp.ne.s32.totalorder %s1771_s15, %s1144_s20 }
  0x9a   : > { %v415_v41 = vcvt.s32.f32 %v399_v39  ;;  %v435_v44 = vunpack.c.h.s8.bf16 %v428_v29  ;;  %v416_v45 = vcvt.s32.f32 %v400_v42  ;;  %v436_v48 = vunpack.c.l.s8.bf16 %v429_v47  ;;  %v1704_v22 = vld [vmem:[%s379_s17] ss:$0 sm:$0xff]  ;;  %s923_s19 = smul.u32 48, %s1920_s8  ;;  %s1150_s21 = scalar_lea.vmem %s1149_s1, 4096 }
  0x9b   : > { %537 = vadd.xlane.f32.xlu0 %v403_v16  ;;  %541 = vadd.xlane.f32.xlu1 %v405_v17  ;;  %v417_v46 = vcvt.s32.f32 %v401_v43  ;;  %v437_v49 = vunpack.c.h.s8.bf16 %v429_v47  ;;  %v419_v50 = vunpack.c.h.s8.bf16 %v1634_v3  ;;  %v423_v51 = vunpack.c.h.s8.bf16 %v1637_v4  ;;  %v1678_v4 = vld [vmem:[%s376_s14] ss:$0 sm:$0xff]  ;;  %s1921_s14 = sld [smem:[#allocation26_spill]]  ;;  %p1923_p2 = scmp.ne.s32.totalorder %s1922_s27, 0 }
  0x9c   : > { %878 = vmatpush3.bf16.xpose.msra.mxu0 %v431_v2  ;;  %916 = vmatpush3.bf16.xpose.msra.mxu1 %v431_v2  ;;  %v420_v52 = vunpack.c.l.s8.bf16 %v1647_v15  ;;  %v424_v53 = vunpack.c.l.s8.bf16 %v385_v35  ;;  %v421_v54 = vunpack.c.h.s8.bf16 %v1647_v15  ;;  %v425_v55 = vunpack.c.h.s8.bf16 %v385_v35  ;;  %s1735_s13 = sadd.s32 %s1282_s30, %s923_s19  ;;  %p1151_p11 = scmp.lt.s32.totalorder %s1771_s15, %s1149_s1 }
  0x9d   : > { %879 = vmatprep.subr.bf16.mxu0 %v432_v14  ;;  %909 = vmatprep.subr.bf16.mxu1 %v432_v14  ;;  %s854_s30 = sshll.u32 %s1735_s13, 7  ;;  %p1146_p10 = pnand %p1145_p9, %p1923_p2 }
  0x9e   : > { %p1152_p12 = scmp.lt.s32.totalorder %s1150_s21, %s1144_s20 }
  0x9f   : > { %543 = vadd.xlane.f32.xlu0 %v406_v20  ;;  %545 = vadd.xlane.f32.xlu1 %v407_v21  ;;  %p1147_p8 = pneg %p1146_p10 }
  0xa0   : > { %p1153_p7 = por %p1152_p12, %p1151_p11 }
  0xa1   : > { %s1765_s12 = scalar_lea.hbm %s1921_s14, %s854_s30 }
  0xa2   : > { %p1154_p3 = pnand %p1153_p7, %p1147_p8 }
  0xa3   : > { %547 = vadd.xlane.f32.xlu0 %v408_v25  ;;  %549 = vadd.xlane.f32.xlu1 %v409_v26 }
  0xa4   : > { %880 = vmatpush3.bf16.xpose.msra.mxu0 %v432_v14  ;;  %917 = vmatpush3.bf16.xpose.msra.mxu1 %v432_v14 }
  0xa5   : > { %881 = vmatprep.subr.bf16.mxu0 %v433_v24  ;;  %910 = vmatprep.subr.bf16.mxu1 %v433_v24 }
  0xa7   : > { %551 = vadd.xlane.f32.xlu0 %v410_v30  ;;  %553 = vadd.xlane.f32.xlu1 %v411_v31 }
  0xab   : > { %555 = vadd.xlane.f32.xlu0 %v412_v36  ;;  %557 = vadd.xlane.f32.xlu1 %v413_v37 }
  0xac   : > { %882 = vmatpush3.bf16.xpose.msra.mxu0 %v433_v24  ;;  %918 = vmatpush3.bf16.xpose.msra.mxu1 %v433_v24 }
  0xad   : > { %883 = vmatprep.subr.bf16.mxu0 %v434_v34  ;;  %911 = vmatprep.subr.bf16.mxu1 %v434_v34 }
  0xaf   : > { %559 = vadd.xlane.f32.xlu0 %v414_v40  ;;  %561 = vadd.xlane.f32.xlu1 %v415_v41 }
  0xb3   : > { %563 = vadd.xlane.f32.xlu0 %v416_v45  ;;  %565 = vadd.xlane.f32.xlu1 %v417_v46 }
  0xb4   : > { %884 = vmatpush3.bf16.xpose.msra.mxu0 %v434_v34  ;;  %919 = vmatpush3.bf16.xpose.msra.mxu1 %v434_v34 }
  0xb5   : > { %885 = vmatprep.subr.bf16.mxu0 %v435_v44  ;;  %912 = vmatprep.subr.bf16.mxu1 %v435_v44 }
  0xbc   : > { %886 = vmatpush3.bf16.xpose.msra.mxu0 %v435_v44  ;;  %920 = vmatpush3.bf16.xpose.msra.mxu1 %v435_v44 }
  0xbd   : > { %887 = vmatprep.subr.bf16.mxu0 %v436_v48  ;;  %913 = vmatprep.subr.bf16.mxu1 %v436_v48 }
  0xc4   : > { %888 = vmatpush3.bf16.xpose.msra.mxu0 %v436_v48  ;;  %921 = vmatpush3.bf16.xpose.msra.mxu1 %v436_v48 }
  0xc5   : > { %889 = vmatprep.subr.bf16.mxu0 %v437_v49  ;;  %914 = vmatprep.subr.bf16.mxu1 %v437_v49 }
  0xcc   : > { %890 = vmatpush3.bf16.xpose.msra.mxu0 %v437_v49  ;;  %922 = vmatpush3.bf16.xpose.msra.mxu1 %v437_v49 }
  0xd3   : > { %892 = vmatmul.mubr.bf16.vlgmr.msra.gmra.mrb[0].mxu0 %v419_v50  ;;  %900 = vmatmul.mubr.bf16.vlgmr.msra.gmra.mrb[0].mxu1 %v423_v51 }
  0xd4   : > { %895 = vmatprep.mubr.bf16.mxu0 %v420_v52  ;;  %903 = vmatprep.mubr.bf16.mxu1 %v424_v53 }
  0xdb   : > { %896 = vmatmul.mubr.bf16.gmra.mrb[4].mxu0 %v421_v54  ;;  %904 = vmatmul.mubr.bf16.gmra.mrb[4].mxu1 %v425_v55 }
 0x124   : > { %v536_v56 = vpop.xlane.xlu0 %535  ;;  %v540_v57 = vpop.xlane.xlu1 %539 }
 0x125   : > { %v597_v9 = vmul.f32 %v1678_v4, %v536_v56  ;;  %v599_v10 = vmul.f32 %v1678_v4, %v540_v57 }
 0x128   : > { %v538_v58 = vpop.xlane.xlu0 %537  ;;  %v542_v59 = vpop.xlane.xlu1 %541 }
 0x129   : > { %v598_v11 = vmul.f32 %v1678_v4, %v538_v58  ;;  %v600_v14 = vmul.f32 %v1678_v4, %v542_v59 }
 0x12c   : > { %v544_v60 = vpop.xlane.xlu0 %543  ;;  %v1664_v61 = vpop.xlane.xlu1 %545 }
 0x12d   : > { %v601_v47 = vmul.f32 %v1678_v4, %v544_v60  ;;  %v602_v51 = vmul.f32 %v1678_v4, %v1664_v61 }
 0x130   : > { %v1666_v62 = vpop.xlane.xlu0 %547  ;;  %v1668_v63 = vpop.xlane.xlu1 %549 }
 0x131   : > { %v603_v52 = vmul.f32 %v1678_v4, %v1666_v62  ;;  %v604_v57 = vmul.f32 %v1678_v4, %v1668_v63 }
 0x134   : > { %v552_v0 = vpop.xlane.xlu0 %551  ;;  %v554_v1 = vpop.xlane.xlu1 %553 }
 0x135   : > { %v605_v20 = vmul.f32 %v1678_v4, %v552_v0  ;;  %v606_v21 = vmul.f32 %v1678_v4, %v554_v1 }
 0x138   : > { %v556_v2 = vpop.xlane.xlu0 %555  ;;  %v558_v3 = vpop.xlane.xlu1 %557 }
 0x139   : > { %v607_v7 = vmul.f32 %v1678_v4, %v556_v2  ;;  %v608_v19 = vmul.f32 %v1678_v4, %v558_v3 }
 0x13c   : > { %v1683_v6 = vpop.xlane.xlu0 %559  ;;  %v1689_v8 = vpop.xlane.xlu1 %561 }
 0x13d   : > { %v609_v0 = vmul.f32 %v1678_v4, %v1683_v6  ;;  %v610_v1 = vmul.f32 %v1678_v4, %v1689_v8 }
 0x140   : > { %v564_v37 = vpop.xlane.xlu0 %563  ;;  %v566_v46 = vpop.xlane.xlu1 %565 }
 0x141   : > { %v611_v50 = vmul.f32 %v1678_v4, %v564_v37  ;;  %v612_v62 = vmul.f32 %v1678_v4, %v566_v46 }
 0x1a6   : > { %v893_v12 = vpop.f32.mrb[0].mxu0  ;;  %v901_v13 = vpop.f32.mrb[0].mxu1 }
 0x1a7   : > { %v576_v15 = vmul.f32 %v893_v12, %v1681_v5  ;;  %v584_v16 = vmul.f32 %v901_v13, %v1681_v5  ;;  %v472_v17 = vpop.f32.mrb[1].mxu0  ;;  %v504_v18 = vpop.f32.mrb[1].mxu1 }
 0x1a8   : > { %v574_v23 = vmul.f32 %v1681_v5, %v472_v17  ;;  %v582_v24 = vmul.f32 %v1681_v5, %v504_v18  ;;  %v894_v25 = vpop.f32.mrb[2].mxu0  ;;  %v902_v26 = vpop.f32.mrb[2].mxu1 }
 0x1a9   : > { %v615_v27 = vsub.f32 %v576_v15, %v599_v10  ;;  %v623_v28 = vsub.f32 %v584_v16, %v607_v7  ;;  %v577_v29 = vmul.f32 %v894_v25, %v1681_v5  ;;  %v585_v30 = vmul.f32 %v902_v26, %v1681_v5  ;;  %v475_v31 = vpop.f32.mrb[3].mxu0  ;;  %v507_v32 = vpop.f32.mrb[3].mxu1 }
 0x1aa   : > { %v613_v33 = vsub.f32 %v574_v23, %v597_v9  ;;  %v621_v34 = vsub.f32 %v582_v24, %v605_v20  ;;  %v575_v35 = vmul.f32 %v1681_v5, %v475_v31  ;;  %v583_v36 = vmul.f32 %v1681_v5, %v507_v32 }
 0x1ab   : > { %v638_v38 = vadd.f32 %v1704_v22, %v615_v27  ;;  %v646_v39 = vadd.f32 %v1704_v22, %v623_v28  ;;  %v616_v40 = vsub.f32 %v577_v29, %v600_v14  ;;  %v624_v41 = vsub.f32 %v585_v30, %v608_v19 }
 0x1ac   : > { %v636_v42 = vadd.f32 %v1704_v22, %v613_v33  ;;  %v644_v43 = vadd.f32 %v1704_v22, %v621_v34  ;;  %v614_v44 = vsub.f32 %v575_v35, %v598_v11  ;;  %v622_v45 = vsub.f32 %v583_v36, %v606_v21 }
 0x1ad   : > { %654 = vst [vmem:[%s1719_s18 + $0x10] sm:$0xff] %v638_v38  ;;  %662 = vst [vmem:[%s1719_s18 + $0x50] sm:$0xff] %v646_v39  ;;  %v639_v48 = vadd.f32 %v1704_v22, %v616_v40  ;;  %v647_v49 = vadd.f32 %v1704_v22, %v624_v41 }
 0x1ae   : > { %652 = vst [vmem:[%s1719_s18] sm:$0xff] %v636_v42  ;;  %660 = vst [vmem:[%s1719_s18 + $0x40] sm:$0xff] %v644_v43  ;;  %v637_v53 = vadd.f32 %v1704_v22, %v614_v44  ;;  %v645_v54 = vadd.f32 %v1704_v22, %v622_v45  ;;  %v897_v55 = vpop.f32.mrb[4].mxu0  ;;  %v905_v56 = vpop.f32.mrb[4].mxu1 }
 0x1af   : > { %655 = vst [vmem:[%s1719_s18 + $0x18] sm:$0xff] %v639_v48  ;;  %663 = vst [vmem:[%s1719_s18 + $0x58] sm:$0xff] %v647_v49  ;;  %v580_v58 = vmul.f32 %v897_v55, %v1681_v5  ;;  %v588_v59 = vmul.f32 %v905_v56, %v1681_v5  ;;  %v488_v60 = vpop.f32.mrb[5].mxu0  ;;  %v520_v61 = vpop.f32.mrb[5].mxu1 }
 0x1b0   : > { %653 = vst [vmem:[%s1719_s18 + $0x8] sm:$0xff] %v637_v53  ;;  %661 = vst [vmem:[%s1719_s18 + $0x48] sm:$0xff] %v645_v54  ;;  %v578_v63 = vmul.f32 %v1681_v5, %v488_v60  ;;  %v586_v2 = vmul.f32 %v1681_v5, %v520_v61  ;;  %v898_v3 = vpop.f32.mrb[6].mxu0  ;;  %v906_v7 = vpop.f32.mrb[6].mxu1 }
 0x1b1   : > { %v619_v9 = vsub.f32 %v580_v58, %v603_v52  ;;  %v627_v10 = vsub.f32 %v588_v59, %v611_v50  ;;  %v581_v11 = vmul.f32 %v898_v3, %v1681_v5  ;;  %v589_v12 = vmul.f32 %v906_v7, %v1681_v5  ;;  %v491_v13 = vpop.f32.mrb[7].mxu0  ;;  %v523_v14 = vpop.f32.mrb[7].mxu1 }
 0x1b2   : > { %v617_v6 = vsub.f32 %v578_v63, %v601_v47  ;;  %v625_v4 = vsub.f32 %v586_v2, %v609_v0  ;;  %v579_v8 = vmul.f32 %v1681_v5, %v491_v13  ;;  %v587_v15 = vmul.f32 %v1681_v5, %v523_v14 }
 0x1b3   : > { %v642_v16 = vadd.f32 %v1704_v22, %v619_v9  ;;  %v650_v17 = vadd.f32 %v1704_v22, %v627_v10  ;;  %v620_v18 = vsub.f32 %v581_v11, %v604_v57  ;;  %v628_v19 = vsub.f32 %v589_v12, %v612_v62 }
 0x1b4   : > { %v640_v20 = vadd.f32 %v1704_v22, %v617_v6  ;;  %v648_v21 = vadd.f32 %v1704_v22, %v625_v4  ;;  %v618_v23 = vsub.f32 %v579_v8, %v602_v51  ;;  %v626_v5 = vsub.f32 %v587_v15, %v610_v1 }
 0x1b5   : > { %658 = vst [vmem:[%s1719_s18 + $0x30] sm:$0xff] %v642_v16  ;;  %666 = vst [vmem:[%s1719_s18 + $0x70] sm:$0xff] %v650_v17  ;;  %v643_v24 = vadd.f32 %v1704_v22, %v620_v18  ;;  %v651_v25 = vadd.f32 %v1704_v22, %v628_v19 }
 0x1b6   : > { %656 = vst [vmem:[%s1719_s18 + $0x20] sm:$0xff] %v640_v20  ;;  %664 = vst [vmem:[%s1719_s18 + $0x60] sm:$0xff] %v648_v21  ;;  %v641_v26 = vadd.f32 %v1704_v22, %v618_v23  ;;  %v649_v27 = vadd.f32 %v1704_v22, %v626_v5 }
 0x1b7   : > { %659 = vst [vmem:[%s1719_s18 + $0x38] sm:$0xff] %v643_v24  ;;  %667 = vst [vmem:[%s1719_s18 + $0x78] sm:$0xff] %v651_v25 }
 0x1b8   : > { %657 = vst [vmem:[%s1719_s18 + $0x28] sm:$0xff] %v641_v26  ;;  %665 = vst [vmem:[%s1719_s18 + $0x68] sm:$0xff] %v649_v27 }
 0x1b9   : > { %1157 = shalt.err (!%p1154_p3)
}
 0x1ba   : > { %s1158_s3 = scalar_lea.hbm %s1765_s12, 2048  ;;  %s1162_s8 = scalar_lea.hbm %s1921_s14, 12288 }
 0x1bb   : > { %p1159_p5 = scmp.ne.s32.totalorder %s1765_s12, %s1158_s3  ;;  %p1163_p1 = scmp.lt.u32.totalorder %s1765_s12, %s1921_s14 }
 0x1bc   : > { %p1164_p13 = scmp.lt.u32.totalorder %s1162_s8, %s1158_s3  ;;  %p1166_p9 = scmp.lt.u32.totalorder %s1158_s3, %s1765_s12 }
 0x1bd   : > { %p1160_p6 = pnand %p1159_p5, %p1923_p2 }
 0x1be   : > { %p1165_p4 = por %p1164_p13, %p1163_p1 }
 0x1bf   : > { %p1161_p0 = pneg %p1160_p6 }
 0x1c0   : > { %p1167_p10 = por %p1166_p9, %p1165_p4 }
 0x1c2   : > { %p1168_p8 = pnand %p1167_p10, %p1161_p0 }
 0x1c4   : > { %1171 = shalt.err (!%p1168_p8)
}
 0x1c5   : > { %s1306_s13 = smov 128   ;;  %s1307_s30 = smov 384  }
 0x1c6   : > { %s1308_s16 = smov 8  }
 0x1c7   : > { %932 = dma.vmem_to_hbm [thread:$0]  (%p1923_p2), %s1771_s15, 2048, %s1765_s12, %s1783_s6, %s1306_s13, %s1307_s30, %s1308_s16  }
 0x1c8 PF: > { %s1924_s24 = sld [smem:[#allocation14_spill]]  ;;  %s1925_s20 = sld [smem:[#allocation18_spill]] }
 0x1c9   : > { %p952_p11 = scmp.ge.s32.totalorder %s1298_s10, 2 }
 0x1ce   : > { %s699_s5 = sand.u32 1, %s1924_s24   ;;  %p1926_p12 = scmp.ne.s32.totalorder %s1925_s20, 0 }
 0x1cf   : > { %s700_s1 = scalar_lea.sflag [#allocation4], %s699_s5 }
 0x1d0   : > { %p946_p7 = pnand %p952_p11, %p1926_p12 }
 0x1d2   : > { %1241 = dma.done.wait (!%p946_p7), %s700_s1, 2048  }
 0x1d3   : > { %1243 = vsyncadd (!%p946_p7), %s700_s1, 4294965248  ;;  %s26_s10 = sadd.s32 1, %s1298_s10   ;;  %s1928_s15 = sld [smem:[#allocation20_spill]] }
 0x1d4   : > { %p1812_p3 = scmp.ge.s32.totalorder %s26_s10, 8   ;;  %s1929_s30 = sld [smem:[#allocation16_spill]] }
 0x1d5   : > { %s1930_s8 = sld [smem:[#allocation19_spill]]  ;;  %s1932_s21 = smov %s1250_s22 }
 0x1d6   : > { %s1933_s22 = smov %s1254_s23  ;;  %s1934_s23 = smov %s1569_s11 }
 0x1d7   : > { %s1935_s24 = smov %s1262_s25  ;;  %s1936_s25 = smov %s1266_s26 }
 0x1d8   : > { %s1938_s27 = smov %s1274_s28  ;;  %s1939_s28 = smov %s1278_s29 }
 0x1d9   : > { %s1937_s26 = smov %s1928_s15  ;;  %s1940_s29 = smov %s1564_s4 }
 0x1da   : > { %s1941_s7 = smov %s1294_s9  ;;  %s1942_s9 = smov %s1948_s0 }
 0x1db   :  { %25 = sbr.rel (!%p1812_p3) target bundleno = 20 (0x14), region = 116 }
 0x1e2   :  { %705 = vsyncpa [#allocation3], 1 }
 0x1e3   :  { %707 = vsyncpa [#allocation3 + $0x1], 1 }
 0x1e4   :  { %708 = vsyncpa [#allocation8], 1 }
 0x1e5   :  { %710 = vsyncpa [#allocation8 + $0x1], 1 }
 0x1e6   :  { %711 = vsyncpa [#allocation4], 1 }
 0x1e7   :  { %713 = vsyncpa [#allocation4 + $0x1], 1 }
 0x1e8   :  { %714 = vsyncpa [#allocation5], 1 }
 0x1e9   :  { %716 = vsyncpa [#allocation5 + $0x1], 1 }

</bundles_post_ra>
